<compile_context>
chip_gen: v5e
topology: v5e:2x2
jax: 0.10.0
libtpu: 0.0.40
codegen_flags: <defaults>
</compile_context>

<pallas_src>
import functools

import jax
import jax.numpy as jnp
from jax.experimental import pallas as pl
from jax.experimental.pallas import tpu as pltpu


def _round_up(x, m):
    return ((x + m - 1) // m) * m


def _weighted_l1_kernel(y_in_ref, y_tgt_ref, phi_ref, out_ref, acc_ref, *, inv_b):
    i = pl.program_id(0)

    @pl.when(i == 0)
    def _():
        acc_ref[...] = jnp.zeros_like(acc_ref)

    a = y_in_ref[...].astype(jnp.float32)          # cast inside the kernel (bf16-friendly)
    t = y_tgt_ref[...].astype(jnp.float32)
    err = jnp.abs(a - t)                           # (TM, W)
    weighted = err * phi_ref[...]                  # phi (1, W) broadcasts over rows
    acc_ref[...] += jnp.sum(weighted)              # single full reduction per tile

    @pl.when(i == pl.num_programs(0) - 1)
    def _():
        # mean over the true batch == total sum / B (zero-padded rows add nothing).
        out_ref[...] = acc_ref[...] * inv_b


def learned_loss_weighted_mse(y_in, y_target, phi, *, tile_rows=512):
    """Pallas equivalent of LearnedLossWeightedMse.forward (mean of phi-weighted L1)."""
    assert y_in.ndim == 2 and y_in.shape == y_target.shape
    B, D = y_in.shape

    # Pack `pack` consecutive batch rows into one 128-lane row when D divides 128.
    pack = 128 // D if (D <= 128 and 128 % D == 0) else 1
    W = pack * D
    phi_row = jnp.tile(phi.astype(jnp.float32).reshape(1, D), (1, pack))     # (1, W)

    rows = -(-B // pack)                                   # packed rows of real data
    tm = _round_up(min(tile_rows, _round_up(rows, 8)), 8)  # sublane-aligned tile rows
    rows_pad = _round_up(max(rows, 1), tm)
    grid = rows_pad // tm

    pad = rows_pad * W - B * D

    def _pack(x):
        flat = jnp.pad(x.reshape(-1), (0, pad))            # zero padding -> err == 0
        return flat.reshape(rows_pad, W)

    y_in_p = _pack(y_in)
    y_tgt_p = _pack(y_target)

    kernel = functools.partial(_weighted_l1_kernel, inv_b=float(1.0 / B))

    out = pl.pallas_call(
        kernel,
        out_shape=jax.ShapeDtypeStruct((1, 1), jnp.float32),
        grid_spec=pltpu.PrefetchScalarGridSpec(
            num_scalar_prefetch=0,
            grid=(grid,),
            in_specs=[
                pl.BlockSpec((tm, W), lambda i: (i, 0)),
                pl.BlockSpec((tm, W), lambda i: (i, 0)),
                pl.BlockSpec((1, W), lambda i: (0, 0)),
            ],
            out_specs=pl.BlockSpec((1, 1), lambda i: (0, 0)),
            scratch_shapes=[pltpu.VMEM((1, 1), jnp.float32)],
        ),
        compiler_params=pltpu.CompilerParams(
            dimension_semantics=("arbitrary",),            # reduction axis
        ),
    )(y_in_p, y_tgt_p, phi_row)
    return out[0, 0]


def init_params(out_dim):
    """Deterministic parameter init mirroring the module's __init__/reset().

    Only `phi` participates in forward(); fc1/fc2/output (fixed 301/20 shapes in the
    PyTorch module) are dead code in the forward pass and kept only as placeholders.
    """
    phi = jnp.ones((out_dim,), dtype=jnp.float32)          # self.phi = ones(out_dim)
    return dict(
        phi=phi,
        fc1=(jnp.zeros((20, 301), jnp.float32), jnp.zeros((20,), jnp.float32)),
        fc2=(jnp.zeros((20, 20), jnp.float32), jnp.zeros((20,), jnp.float32)),
        output=(jnp.zeros((301, 20), jnp.float32), jnp.zeros((301,), jnp.float32)),
    )


if __name__ == "__main__":
    key = jax.random.PRNGKey(0)

    def ref_loss(y_in, y_target, phi):
        return jnp.mean(jnp.sum(jnp.abs(y_in - y_target) * phi[None, :], axis=1))

    # Case 1: shapes consistent with the module (batch=8, out_dim=16), phi = ones.
    B, out_dim = 8, 16
    params = init_params(out_dim)
    k1, k2, k3, k4 = jax.random.split(key, 4)
    y_in = jax.random.normal(k1, (B, out_dim), dtype=jnp.float32)
    y_tgt = jax.random.normal(k2, (B, out_dim), dtype=jnp.float32)
    loss = jax.block_until_ready(learned_loss_weighted_mse(y_in, y_tgt, params["phi"]))
    ref = ref_loss(y_in, y_tgt, params["phi"])
    assert jnp.allclose(loss, ref, rtol=1e-5, atol=1e-5), (loss, ref)

    # Case 2: batch not a multiple of the 8-row lane packing, multi-tile grid,
    # non-uniform phi -> exercises zero padding, the accumulator and the finalize step.
    B2 = 100
    phi2 = jnp.linspace(0.1, 2.0, out_dim, dtype=jnp.float32)
    y_in2 = jax.random.normal(k3, (B2, out_dim), dtype=jnp.float32)
    y_tgt2 = jax.random.normal(k4, (B2, out_dim), dtype=jnp.float32)
    loss2 = jax.block_until_ready(
        learned_loss_weighted_mse(y_in2, y_tgt2, phi2, tile_rows=8))
    ref2 = ref_loss(y_in2, y_tgt2, phi2)
    assert jnp.allclose(loss2, ref2, rtol=1e-5, atol=1e-5), (loss2, ref2)

    print("KERNEL_OK")
</pallas_src>

<mosaic_0001>
module attributes {stable_mosaic.version = 11 : i64} {
  func.func @_weighted_l1_kernel(%arg0: i32, %arg1: memref<8x128xf32, #tpu.memory_space<vmem>>, %arg2: memref<8x128xf32, #tpu.memory_space<vmem>>, %arg3: memref<1x128xf32, #tpu.memory_space<vmem>>, %arg4: memref<1x1xf32, #tpu.memory_space<vmem>>, %arg5: memref<1x1xf32, #tpu.memory_space<vmem>>) attributes {dimension_semantics = [#tpu.dimension_semantics<arbitrary>], iteration_bounds = array<i64: 1>, scalar_prefetch = 0 : i64, scratch_operands = 1 : i64, tpu.core_type = #tpu.core_type<tc>, window_params = [{transform_indices = @transform_0, window_bounds = array<i64: 8, 128>}, {transform_indices = @transform_1, window_bounds = array<i64: 8, 128>}, {pipeline_mode = #tpu.pipeline_mode<synchronous>, transform_indices = @transform_2, window_bounds = array<i64: 1, 128>}, {pipeline_mode = #tpu.pipeline_mode<synchronous>, transform_indices = @transform_3, window_bounds = array<i64: 1, 1>}]} {
    %c0_i32 = arith.constant 0 : i32
    %0 = arith.cmpi eq, %arg0, %c0_i32 : i32
    %1 = arith.extui %0 : i1 to i32
    %c0_i32_0 = arith.constant 0 : i32
    %2 = arith.cmpi ne, %1, %c0_i32_0 : i32
    scf.if %2 {
      %cst_12 = arith.constant 0.000000e+00 : f32
      %21 = vector.broadcast %cst_12 : f32 to vector<1x1xf32>
      %c0_13 = arith.constant 0 : index
      %c0_14 = arith.constant 0 : index
      %22 = vector.load %arg5[%c0_13, %c0_14] : memref<1x1xf32, #tpu.memory_space<vmem>>, vector<1x1xf32>
      tpu.vector_store %arg5[%c0_13, %c0_14], %21 {strides = array<i32>} : memref<1x1xf32, #tpu.memory_space<vmem>>, vector<1x1xf32>,
    } else {
    }
    %c0 = arith.constant 0 : index
    %c0_1 = arith.constant 0 : index
    %3 = vector.load %arg1[%c0, %c0_1] : memref<8x128xf32, #tpu.memory_space<vmem>>, vector<8x128xf32>
    %c0_2 = arith.constant 0 : index
    %c0_3 = arith.constant 0 : index
    %4 = vector.load %arg2[%c0_2, %c0_3] : memref<8x128xf32, #tpu.memory_space<vmem>>, vector<8x128xf32>
    %5 = arith.subf %3, %4 : vector<8x128xf32>
    %6 = math.absf %5 : vector<8x128xf32>
    %c0_4 = arith.constant 0 : index
    %c0_5 = arith.constant 0 : index
    %7 = vector.load %arg3[%c0_4, %c0_5] : memref<1x128xf32, #tpu.memory_space<vmem>>, vector<1x128xf32>
    %8 = vector.broadcast %7 : vector<1x128xf32> to vector<8x128xf32>
    %9 = arith.mulf %6, %8 : vector<8x128xf32>
    %c0_6 = arith.constant 0 : index
    %c0_7 = arith.constant 0 : index
    %10 = vector.load %arg5[%c0_6, %c0_7] : memref<1x1xf32, #tpu.memory_space<vmem>>, vector<1x1xf32>
    %11 = vector.shape_cast %9 : vector<8x128xf32> to vector<1x8x128xf32>
    %cst = arith.constant dense<0.000000e+00> : vector<1xf32>
    %12 = vector.multi_reduction <add>, %11, %cst [1, 2] : vector<1x8x128xf32> to vector<1xf32>
    %13 = vector.shape_cast %12 : vector<1xf32> to vector<1x1x1xf32>
    %14 = vector.extract %13[0, 0, 0] : f32 from vector<1x1x1xf32>
    %15 = vector.broadcast %14 : f32 to vector<1x1xf32>
    %16 = arith.addf %10, %15 : vector<1x1xf32>
    %c0_8 = arith.constant 0 : index
    %c0_9 = arith.constant 0 : index
    %17 = vector.load %arg5[%c0_8, %c0_9] : memref<1x1xf32, #tpu.memory_space<vmem>>, vector<1x1xf32>
    tpu.vector_store %arg5[%c0_8, %c0_9], %16 {strides = array<i32>} : memref<1x1xf32, #tpu.memory_space<vmem>>, vector<1x1xf32>,
    %c0_i32_10 = arith.constant 0 : i32
    %18 = arith.cmpi eq, %arg0, %c0_i32_10 : i32
    %19 = arith.extui %18 : i1 to i32
    %c0_i32_11 = arith.constant 0 : i32
    %20 = arith.cmpi ne, %19, %c0_i32_11 : i32
    scf.if %20 {
      %c0_12 = arith.constant 0 : index
      %c0_13 = arith.constant 0 : index
      %21 = vector.load %arg5[%c0_12, %c0_13] : memref<1x1xf32, #tpu.memory_space<vmem>>, vector<1x1xf32>
      %cst_14 = arith.constant 1.250000e-01 : f32
      %22 = vector.broadcast %cst_14 : f32 to vector<1x1xf32>
      %23 = arith.mulf %21, %22 : vector<1x1xf32>
      %c0_15 = arith.constant 0 : index
      %c0_16 = arith.constant 0 : index
      %24 = vector.load %arg4[%c0_15, %c0_16] : memref<1x1xf32, #tpu.memory_space<vmem>>, vector<1x1xf32>
      tpu.vector_store %arg4[%c0_15, %c0_16], %23 {strides = array<i32>} : memref<1x1xf32, #tpu.memory_space<vmem>>, vector<1x1xf32>,
    } else {
    }
    return
  }
  func.func @transform_0(%arg0: i32) -> (i32, i32) {
    %c0_i32 = arith.constant 0 : i32
    %c0_i32_0 = arith.constant 0 : i32
    return %arg0, %c0_i32 : i32, i32
  }
  func.func @transform_1(%arg0: i32) -> (i32, i32) {
    %c0_i32 = arith.constant 0 : i32
    %c0_i32_0 = arith.constant 0 : i32
    return %arg0, %c0_i32 : i32, i32
  }
  func.func @transform_2(%arg0: i32) -> (i32, i32) {
    %c0_i32 = arith.constant 0 : i32
    %c0_i32_0 = arith.constant 0 : i32
    %c0_i32_1 = arith.constant 0 : i32
    return %c0_i32, %c0_i32_0 : i32, i32
  }
  func.func @transform_3(%arg0: i32) -> (i32, i32) {
    %c0_i32 = arith.constant 0 : i32
    %c0_i32_0 = arith.constant 0 : i32
    %c0_i32_1 = arith.constant 0 : i32
    return %c0_i32, %c0_i32_0 : i32, i32
  }
}

</mosaic_0001>

<bundles_post_ra>
// kernel: tpu_custom_call.1
= control target key start
LH: loop header
LB: loop body
LE: loop exit
PB: predicated region body
PF: predicated region fallthrough
CT: control target
= control target key end

     0   :  { %8 = vsyncpa [#allocation4], 0  ;;  %s220_s0 = inlined_call_operand.hbm [shape: f32[8,128], index: 0, kind: input, shape index: {}]   ;;  %s221_s1 = inlined_call_operand.hbm [shape: f32[8,128], index: 1, kind: input, shape index: {}]   ;;  %s222_s2 = inlined_call_operand.vmem [shape: f32[1,128], index: 2, kind: input, shape index: {}]   ;;  %s223_s3 = inlined_call_operand.hbm [shape: f32[1,1], index: 3, kind: output, shape index: {}]  }
   0x1   :  { %9 = vsyncpa [#allocation7], 0 }
   0x2   :  { %10 = vsyncpa [#allocation5], 0  ;;  %s16_s14 = sshll.u32 %s220_s0, 4  ;;  %s181_s15 = smov [#allocation3]   ;;  %s17_s14 = int_to_ptr.hbm [resolvable:$true] %s16_s14 }
   0x3   :  { %s18_s16 = sshll.u32 %s181_s15, 4  ;;  %s27_s19 = sshll.u32 %s221_s1, 4  ;;  %s19_s16 = int_to_ptr.vmem [resolvable:$true] %s18_s16  ;;  %s28_s19 = int_to_ptr.hbm [resolvable:$true] %s27_s19 }
   0x4   :  { %21 = dma.hbm_to_vmem [thread:$0]  %s17_s14, 128, %s19_s16, [#allocation4]  }
   0x5   :  { %s182_s20 = smov [#allocation6]  }
   0x6   :  { %s29_s21 = sshll.u32 %s182_s20, 4  ;;  %s30_s21 = int_to_ptr.vmem [resolvable:$true] %s29_s21 }
   0x7   :  { %32 = dma.hbm_to_vmem [thread:$0]  %s28_s19, 128, %s30_s21, [#allocation7]  }
   0x8   :  { %175 = dma.done.wait [#allocation4], 128  }
   0x9   :  { %176 = vsyncadd [#allocation4], 4294967168 }
   0xa   :  { %177 = dma.done.wait [#allocation7], 128  }
   0xb   :  { %178 = vsyncadd [#allocation7], 4294967168  ;;  %v49_v0 = vld [vmem:[#allocation3] sm:$0xff]  ;;  %v50_v1 = vld [vmem:[#allocation6] sm:$0xff]  ;;  %vm47_vm0 = vcmask 0   ;;  %v183_v6 = vmov 0.0  }
   0xc   :  { %v51_v2 = vsub.f32 %v49_v0, %v50_v1  ;;  %v102_v3 = vld [vmem:[%s222_s2] ss:$0 sm:$0xff]  ;;  %48 = vst.msk [vmem:[#allocation2] sm:$0x1] %vm47_vm0, %v183_v6  ;;  %s184_s2 = smov [#allocation8]   ;;  %s85_s26 = sshll.u32 %s223_s3, 4  ;;  %s86_s26 = int_to_ptr.hbm [resolvable:$true] %s85_s26 }
   0xd   :  { %s83_s23 = sshll.u32 %s184_s2, 4  ;;  %s84_s23 = int_to_ptr.vmem [resolvable:$true] %s83_s23 }
   0xe   :  { %v52_v4 = vand.u32 2147483647, %v51_v2 }
  0x10   :  { %v57_v5 = vmul.f32 %v102_v3, %v52_v4 }
  0x12   :  { %59 = vadd.xlane.f32.xlu0 %v57_v5 }
  0x13   :  { %v58_v14 = vld [vmem:[#allocation2] sm:$0x1] }
  0x85   :  { %v60_v7 = vpop.xlane.xlu0 %59 }
  0x86   :  { %v61_v8 = vrot.slane %v60_v7, 4 }
  0x88   :  { %v62_v9 = vadd.f32 %v61_v8, %v60_v7 }
  0x8a   :  { %v63_v10 = vrot.slane %v62_v9, 2 }
  0x8c   :  { %v64_v11 = vadd.f32 %v63_v10, %v62_v9 }
  0x8e   :  { %v65_v12 = vrot.slane %v64_v11, 1 }
  0x90   :  { %v66_v13 = vadd.f32 %v65_v12, %v64_v11 }
  0x92   :  { %96 = vpush %v66_v13 }
  0xc3   :  { %s97_s1 = spop %96 }
  0xc4   :  { %v68_v15 = vstv %s97_s1 }
  0xc5   :  { %v69_v16 = vadd.f32 %v68_v15, %v58_v14 }
  0xc7   :  { %71 = vst.msk [vmem:[#allocation2] sm:$0x1] %vm47_vm0, %v69_v16 }
  0xce   :  { %v75_v17 = vld [vmem:[#allocation2] sm:$0x1] }
  0xcf   :  { %v76_v18 = vmul.f32 0.125, %v75_v17 }
  0xd1   :  { %77 = vst.msk [vmem:[#allocation8] sm:$0x1] %vm47_vm0, %v76_v18 }
  0xd2   :  { %88 = dma.vmem_to_hbm [thread:$0]  %s84_s23, 16, %s86_s26, [#allocation5]  }
  0xd3   :  { %179 = dma.done.wait [#allocation5], 16  }
  0xd4   :  { %180 = vsyncadd [#allocation5], 4294967280 }
  0xd5   :  { %93 = vsyncpa [#allocation4], 1 }
  0xd6   :  { %94 = vsyncpa [#allocation7], 1 }
  0xd7   :  { %95 = vsyncpa [#allocation5], 1 }

</bundles_post_ra>
